<compile_context>
chip_gen: v5e
topology: v5e:2x2
jax: 0.10.0
libtpu: 0.0.40
codegen_flags: <defaults>
</compile_context>

<pallas_src>
import math

import jax
import jax.numpy as jnp
from jax.experimental import pallas as pl
from jax.experimental.pallas import tpu as pltpu


# ----------------------------- kernel ----------------------------------------


def wcnn_pos_kernel(x_ref, wconv_ref, bconv_ref, wfc_ref, bfc_ref, o_ref):
    # x_ref:     (B, L)   input sequence (channel dim of size 1 squeezed outside)
    # wconv_ref: (F, 1)   Conv1d(1, F, kernel_size=1) weight, flattened
    # bconv_ref: (F, 1)   Conv1d bias
    # wfc_ref:   (F, C)   Linear weight (already transposed to row-major matmul)
    # bfc_ref:   (1, C)   Linear bias
    # o_ref:     (B, C)   softmax probabilities
    x = x_ref[...]                                   # (B, L)
    w = wconv_ref[...]                               # (F, 1)
    b = bconv_ref[...]                               # (F, 1)

    # Conv1d with in_channels=1, kernel_size=1, stride=1:
    #   feat[b, f, t] = w[f] * x[b, t] + bias[f]
    # Layout matches PyTorch (B, C_out, L): filters on the sublane axis,
    # sequence length on the lane axis (single vectorized broadcast, no loop).
    feat = x[:, None, :] * w[None, :, :] + b[None, :, :]   # (B, F, L)
    feat = jnp.maximum(feat, 0.0)                           # ReLU

    # F.max_pool1d(feat, L).view(-1, F)  ==  global max over the lane axis.
    pooled = jnp.max(feat, axis=-1)                          # (B, F)

    # fc: Linear(F, C)
    logits = jnp.dot(pooled, wfc_ref[...],
                     preferred_element_type=jnp.float32) + bfc_ref[...]   # (B, C)

    # softmax over the class axis (numerically stabilized).
    m = jnp.max(logits, axis=-1, keepdims=True)
    e = jnp.exp(logits - m)
    denom = jnp.sum(e, axis=-1, keepdims=True)
    probs = e * pl.reciprocal(denom, approx=False)           # EUP reciprocal
    o_ref[...] = probs.astype(o_ref.dtype)


# ----------------------------- wrapper ----------------------------------------


def wcnn_pos_pallas(x, wconv, bconv, wfc, bfc):
    """x: (B, 1, L); wconv: (F, 1, 1); bconv: (F,); wfc: (F, C); bfc: (C,)."""
    B, Cin, L = x.shape
    assert Cin == 1, "wCNN_pos uses a single input channel"
    F = wconv.shape[0]
    C = wfc.shape[1]

    x2d = x.reshape(B, L)                 # squeeze the size-1 channel axis
    wconv2d = wconv.reshape(F, 1)
    bconv2d = bconv.reshape(F, 1)
    bfc2d = bfc.reshape(1, C)

    vmem = pl.BlockSpec(memory_space=pltpu.MemorySpace.VMEM)
    return pl.pallas_call(
        wcnn_pos_kernel,
        out_shape=jax.ShapeDtypeStruct((B, C), x.dtype),
        in_specs=[vmem, vmem, vmem, vmem, vmem],   # whole arrays resident in VMEM
        out_specs=vmem,
    )(x2d, wconv2d, bconv2d, wfc, bfc2d)


# ------------------------- pure-JAX reference ---------------------------------


def wcnn_pos_ref(x, wconv, bconv, wfc, bfc):
    """Literal translation of the PyTorch forward (conv -> relu -> pool -> fc -> softmax)."""
    feat = jax.lax.conv_general_dilated(
        x, wconv, window_strides=(1,), padding="VALID",
        dimension_numbers=("NCH", "OIH", "NCH"))            # (B, F, L)
    feat = feat + bconv[None, :, None]
    feat = jnp.maximum(feat, 0.0)
    pooled = jnp.max(feat, axis=-1)                          # max_pool1d over full length
    logits = pooled @ wfc + bfc[None, :]                     # Linear(F, C)
    return jax.nn.softmax(logits, axis=1)


# ----------------------------- main --------------------------------------------


if __name__ == "__main__":
    B, L = 2, 16
    F, C = 20, 2          # num_filters, num_classes (from the module definition)

    key = jax.random.PRNGKey(0)
    k_x, k_wc, k_bc, k_wf, k_bf = jax.random.split(key, 5)

    # PyTorch-style uniform init bounds (1/sqrt(fan_in)).
    conv_bound = 1.0 / math.sqrt(1 * 1)      # in_channels * kernel_size
    fc_bound = 1.0 / math.sqrt(F)

    wconv = jax.random.uniform(k_wc, (F, 1, 1), jnp.float32, -conv_bound, conv_bound)
    bconv = jax.random.uniform(k_bc, (F,), jnp.float32, -conv_bound, conv_bound)
    # Linear weight stored pre-transposed as (F, C) so the kernel does pooled @ wfc.
    wfc = jax.random.uniform(k_wf, (F, C), jnp.float32, -fc_bound, fc_bound)
    bfc = jax.random.uniform(k_bf, (C,), jnp.float32, -fc_bound, fc_bound)

    x = jax.random.normal(k_x, (B, 1, L), jnp.float32)

    out = wcnn_pos_pallas(x, wconv, bconv, wfc, bfc)
    out = jax.block_until_ready(out)

    ref = wcnn_pos_ref(x, wconv, bconv, wfc, bfc)
    assert out.shape == (B, C)
    assert jnp.allclose(out, ref, atol=1e-5, rtol=1e-5), "mismatch vs pure-JAX reference"
    # Sanity: softmax rows sum to 1.
    assert jnp.allclose(jnp.sum(out, axis=1), jnp.ones((B,)), atol=1e-5)

    print("KERNEL_OK")
</pallas_src>

<mosaic_0001>
module attributes {stable_mosaic.version = 11 : i64} {
  func.func @wcnn_pos_kernel(%arg0: memref<2x16xf32, #tpu.memory_space<vmem>>, %arg1: memref<20x1xf32, #tpu.memory_space<vmem>>, %arg2: memref<20x1xf32, #tpu.memory_space<vmem>>, %arg3: memref<20x2xf32, #tpu.memory_space<vmem>>, %arg4: memref<1x2xf32, #tpu.memory_space<vmem>>, %arg5: memref<2x2xf32, #tpu.memory_space<vmem>>) attributes {dimension_semantics = [], scalar_prefetch = 0 : i64, scratch_operands = 0 : i64, tpu.core_type = #tpu.core_type<tc>} {
    %c0 = arith.constant 0 : index
    %c0_0 = arith.constant 0 : index
    %0 = vector.load %arg0[%c0, %c0_0] : memref<2x16xf32, #tpu.memory_space<vmem>>, vector<2x16xf32>
    %c0_1 = arith.constant 0 : index
    %c0_2 = arith.constant 0 : index
    %1 = vector.load %arg1[%c0_1, %c0_2] : memref<20x1xf32, #tpu.memory_space<vmem>>, vector<20x1xf32>
    %c0_3 = arith.constant 0 : index
    %c0_4 = arith.constant 0 : index
    %2 = vector.load %arg2[%c0_3, %c0_4] : memref<20x1xf32, #tpu.memory_space<vmem>>, vector<20x1xf32>
    %3 = vector.shape_cast %0 : vector<2x16xf32> to vector<2x1x16xf32>
    %4 = vector.shape_cast %1 : vector<20x1xf32> to vector<1x20x1xf32>
    %5 = vector.broadcast %3 : vector<2x1x16xf32> to vector<2x20x16xf32>
    %6 = vector.broadcast %4 : vector<1x20x1xf32> to vector<2x20x16xf32>
    %7 = arith.mulf %5, %6 : vector<2x20x16xf32>
    %8 = vector.shape_cast %2 : vector<20x1xf32> to vector<1x20x1xf32>
    %9 = vector.broadcast %8 : vector<1x20x1xf32> to vector<2x20x16xf32>
    %10 = arith.addf %7, %9 : vector<2x20x16xf32>
    %cst = arith.constant 0.000000e+00 : f32
    %11 = vector.broadcast %cst : f32 to vector<2x20x16xf32>
    %12 = arith.maximumf %10, %11 : vector<2x20x16xf32>
    %cst_5 = arith.constant dense<0xFF800000> : vector<2x20xf32>
    %13 = vector.multi_reduction <maximumf>, %12, %cst_5 [2] : vector<2x20x16xf32> to vector<2x20xf32>
    %c0_6 = arith.constant 0 : index
    %c0_7 = arith.constant 0 : index
    %14 = vector.load %arg3[%c0_6, %c0_7] : memref<20x2xf32, #tpu.memory_space<vmem>>, vector<20x2xf32>
    %cst_8 = arith.constant dense<0.000000e+00> : vector<2x2xf32>
    %15 = tpu.matmul %13, %14, %cst_8 {dimension_numbers = #tpu.dot_dimension_numbers<[1], [0], [0], [1], [0, 0, 1, 1], [], []>} : vector<2x20xf32>, vector<20x2xf32>, vector<2x2xf32> -> vector<2x2xf32>
    %c0_9 = arith.constant 0 : index
    %c0_10 = arith.constant 0 : index
    %16 = vector.load %arg4[%c0_9, %c0_10] : memref<1x2xf32, #tpu.memory_space<vmem>>, vector<1x2xf32>
    %17 = vector.broadcast %16 : vector<1x2xf32> to vector<2x2xf32>
    %18 = arith.addf %15, %17 : vector<2x2xf32>
    %cst_11 = arith.constant dense<0xFF800000> : vector<2xf32>
    %19 = vector.multi_reduction <maximumf>, %18, %cst_11 [1] : vector<2x2xf32> to vector<2xf32>
    %20 = vector.shape_cast %19 : vector<2xf32> to vector<2x1xf32>
    %21 = vector.broadcast %20 : vector<2x1xf32> to vector<2x2xf32>
    %22 = arith.subf %18, %21 : vector<2x2xf32>
    %23 = math.exp %22 : vector<2x2xf32>
    %cst_12 = arith.constant dense<0.000000e+00> : vector<2xf32>
    %24 = vector.multi_reduction <add>, %23, %cst_12 [1] : vector<2x2xf32> to vector<2xf32>
    %25 = vector.shape_cast %24 : vector<2xf32> to vector<2x1xf32>
    %26 = tpu.reciprocal %25 : vector<2x1xf32> -> vector<2x1xf32>
    %27 = vector.broadcast %26 : vector<2x1xf32> to vector<2x2xf32>
    %28 = arith.mulf %23, %27 : vector<2x2xf32>
    %c0_13 = arith.constant 0 : index
    %c0_14 = arith.constant 0 : index
    %29 = vector.load %arg5[%c0_13, %c0_14] : memref<2x2xf32, #tpu.memory_space<vmem>>, vector<2x2xf32>
    tpu.vector_store %arg5[%c0_13, %c0_14], %28 {strides = array<i32>} : memref<2x2xf32, #tpu.memory_space<vmem>>, vector<2x2xf32>,
    return
  }
}

</mosaic_0001>

<bundles_post_ra>
// kernel: tpu_custom_call.1
= control target key start
LH: loop header
LB: loop body
LE: loop exit
PB: predicated region body
PF: predicated region fallthrough
CT: control target
= control target key end

     0   :  { %v240_v2 = vmov 0   ;;  %s315_s0 = inlined_call_operand.vmem [shape: f32[2,16], index: 0, kind: input, shape index: {}]   ;;  %s316_s1 = inlined_call_operand.vmem [shape: f32[20,1], index: 1, kind: input, shape index: {}]   ;;  %s317_s2 = inlined_call_operand.vmem [shape: f32[20,1], index: 2, kind: input, shape index: {}]   ;;  %s318_s3 = inlined_call_operand.vmem [shape: f32[20,2], index: 3, kind: input, shape index: {}]   ;;  %s319_s4 = inlined_call_operand.vmem [shape: f32[1,2], index: 4, kind: input, shape index: {}]   ;;  %s320_s5 = inlined_call_operand.hbm [shape: f32[2,2], index: 5, kind: output, shape index: {}]  }
   0x1   :  { %v24_v0 = vld [vmem:[%s316_s1 + $0x10] sm:$0xf]  ;;  %v22_v1 = vld [vmem:[%s316_s1] sm:$0xff]  ;;  %207 = vset.pattern.permute.xlu1 %v240_v2  ;;  %206 = vset.pattern.permute.xlu0 %v240_v2  ;;  %v26_v3 = vld [vmem:[%s317_s2 + $0x8] sm:$0xff] }
   0x2   :  { %46 = vperm.xlu1 %207, %v24_v0   ;;  %36 = vperm.xlu0 %206, %v22_v1  }
   0x3   :  { %10 = vsyncpa [#allocation3], 0  ;;  %208 = vset.pattern.permute.xlu2 %v240_v2  ;;  %v25_v4 = vld [vmem:[%s317_s2] sm:$0xff]  ;;  %v23_v5 = vld [vmem:[%s316_s1 + $0x8] sm:$0xff]  ;;  %vm82_vm0 = vcmask 130048   ;;  %vm89_vm1 = vcmask 125952   ;;  %v115_v44 = vlaneseq }
   0x4   :  { %62 = vperm.xlu2 %208, %v26_v3   ;;  %v27_v6 = vld [vmem:[%s317_s2 + $0x10] sm:$0xf]  ;;  %v21_v7 = vld [vmem:[%s315_s0] sm:$0x3]  ;;  %vm136_vm2 = vcmask 1043456   ;;  %v103_v42 = vld [vmem:[%s318_s3 + $0x8] sm:$0xff] }
   0x5   :  { %v29_v9 = vrot.slane %v21_v7, 1  ;;  %v30_v12 = vperm.slane %v21_v7, 0  ;;  %v104_v41 = vld [vmem:[%s318_s3 + $0x10] sm:$0xf]  ;;  %v102_v43 = vld [vmem:[%s318_s3] sm:$0xff]  ;;  %v116_v45 = vand.u32 127, %v115_v44 }
   0x6   :  { %202 = vmatpush.msk.msra.mxu0 %vm136_vm2, %v104_v41  ;;  %vm120_vm3 = vcmask 130112   ;;  %vm124_vm4 = vcmask 195712   ;;  %vm131_vm5 = vcmask 1041409   ;;  %vm133_vm6 = vcmask 162816   ;;  %v209_v1 = vld [vmem:[%s319_s4] ss:$0 sm:$0xff] }
   0x7   :  { %v31_v13 = vperm.slane %v29_v9, 0  ;;  %v118_v49 = vadd.s32 4294967288, %v116_v45  ;;  %v122_v50 = vadd.s32 4294967280, %v116_v45  ;;  %vm160_vm7 = vcmask 9216   ;;  %s241_s4 = smov [#allocation2]   ;;  %s193_s14 = sshll.u32 %s320_s5, 4  ;;  %s194_s14 = int_to_ptr.hbm [resolvable:$true] %s193_s14 }
   0x8   :  { %154 = vmatpush.msra.mxu0 %v103_v42  ;;  %s191_s11 = sshll.u32 %s241_s4, 4  ;;  %s192_s11 = int_to_ptr.vmem [resolvable:$true] %s191_s11 }
   0xa   :  { %57 = vperm.xlu1 %207, %v25_v4   ;;  %41 = vperm.xlu0 %206, %v23_v5  }
   0xb   :  { %155 = vmatpush.msra.mxu0 %v102_v43 }
   0xc   :  { %67 = vperm.xlu2 %208, %v27_v6  }
  0x5e   :  { %v63_v8 = vpop.permute.xlu2 %62 }
  0x66   :  { %v68_v19 = vpop.permute.xlu2 %67 }
  0x74   :  { %v47_v10 = vpop.permute.xlu1 %46  ;;  %v37_v11 = vpop.permute.xlu0 %36 }
  0x75   :  { %v49_v14 = vmul.f32 %v37_v11, %v30_v12  ;;  %v52_v15 = vmul.f32 %v37_v11, %v31_v13  ;;  %v51_v16 = vmul.f32 %v47_v10, %v30_v12  ;;  %v54_v24 = vmul.f32 %v47_v10, %v31_v13 }
  0x77   :  { %v72_v28 = vadd.f32 %v68_v19, %v51_v16  ;;  %v75_v33 = vadd.f32 %v68_v19, %v54_v24 }
  0x79   :  { %v78_v35 = vmax.f32 %v72_v28, 0.0  ;;  %v81_v37 = vmax.f32 %v75_v33, 0.0 }
  0x7b   :  { %v90_v38 = vsel %vm89_vm1, %v78_v35, -inf  ;;  %v99_v40 = vsel %vm89_vm1, %v81_v37, -inf }
  0x7c   :  { %v58_v17 = vpop.permute.xlu1 %57  ;;  %v42_v18 = vpop.permute.xlu0 %41 }
  0x7d   :  { %v70_v20 = vadd.f32 %v58_v17, %v49_v14  ;;  %v73_v21 = vadd.f32 %v58_v17, %v52_v15  ;;  %v50_v22 = vmul.f32 %v42_v18, %v30_v12  ;;  %v53_v23 = vmul.f32 %v42_v18, %v31_v13 }
  0x7f   :  { %v76_v25 = vmax.f32 %v70_v20, 0.0  ;;  %v79_v26 = vmax.f32 %v73_v21, 0.0  ;;  %v71_v27 = vadd.f32 %v63_v8, %v50_v22  ;;  %v74_v32 = vadd.f32 %v63_v8, %v53_v23 }
  0x81   :  { %v83_v29 = vsel %vm82_vm0, %v76_v25, -inf  ;;  %v93_v30 = vsel %vm82_vm0, %v79_v26, -inf  ;;  %v77_v31 = vmax.f32 %v71_v27, 0.0  ;;  %v80_v36 = vmax.f32 %v74_v32, 0.0 }
  0x82   :  { %84 = vmax.xlane.f32.xlu0 %v83_v29  ;;  %94 = vmax.xlane.f32.xlu2 %v93_v30 }
  0x83   :  { %v86_v34 = vsel %vm82_vm0, %v77_v31, -inf  ;;  %v96_v39 = vsel %vm82_vm0, %v80_v36, -inf }
  0x84   :  { %87 = vmax.xlane.f32.xlu1 %v86_v34 }
  0x8a   :  { %91 = vmax.xlane.f32.xlu0 %v90_v38  ;;  %97 = vmax.xlane.f32.xlu2 %v96_v39 }
  0x8c   :  { %100 = vmax.xlane.f32.xlu1 %v99_v40 }
  0xf5   :  { %v85_v46 = vpop.xlane.xlu0 %84  ;;  %v95_v47 = vpop.xlane.xlu2 %94 }
  0xf6   :  { %v126_v54 = vperm.slane %v95_v47, %v116_v45  ;;  %v117_v57 = vperm.slane %v85_v46, %v116_v45 }
  0xf7   :  { %v88_v48 = vpop.xlane.xlu1 %87 }
  0xf8   :  { %v119_v51 = vperm.slane %v88_v48, %v118_v49 }
  0xfa   :  { %v121_v61 = vsel %vm120_vm3, %v119_v51, %v117_v57 }
  0xfd   :  { %v92_v52 = vpop.xlane.xlu0 %91  ;;  %v98_v53 = vpop.xlane.xlu2 %97 }
  0xfe   :  { %v123_v55 = vperm.slane %v92_v52, %v122_v50  ;;  %v127_v56 = vperm.slane %v98_v53, %v118_v49 }
  0xff   :  { %v101_v58 = vpop.xlane.xlu1 %100 }
 0x100   :  { %v128_v59 = vsel %vm120_vm3, %v127_v56, %v126_v54  ;;  %v129_v60 = vperm.slane %v101_v58, %v122_v50  ;;  %v125_v62 = vsel %vm124_vm4, %v123_v55, %v121_v61 }
 0x102   :  { %v130_v63 = vsel %vm124_vm4, %v129_v60, %v128_v59 }
 0x103   :  { %v132_v0 = vsel %vm131_vm5, %v130_v63, %v125_v62 }
 0x104   :  { %203 = vmatmul.msk.f32.vlgmr.msra.gmra.mxu0 %vm133_vm6, %v132_v0 }
 0x181   :  { %v157_v2 = vpop.f32.mrf.mxu0 }
 0x182   :  { %v158_v3 = vadd.f32 %v209_v1, %v157_v2 }
 0x184   :  { %v161_v4 = vsel %vm160_vm7, %v158_v3, -inf }
 0x185   :  { %162 = vmax.xlane.f32.xlu2 %v161_v4 }
 0x1f8   :  { %v163_v5 = vpop.xlane.xlu2 %162 }
 0x1f9   :  { %v164_v6 = vsub.f32 %v158_v3, %v163_v5 }
 0x1fb   :  { %v165_v7 = vmul.f32 1.442695, %v164_v6 }
 0x1fd   :  { %210 = vpow2.f32 %v165_v7 }
 0x203   :  { %v211_v8 = vpop.eup %210 }
 0x204   :  { %v167_v9 = vsel %vm160_vm7, %v211_v8, 0.0 }
 0x205   :  { %168 = vadd.xlane.f32.xlu0 %v167_v9 }
 0x278   :  { %v169_v10 = vpop.xlane.xlu0 %168 }
 0x279   :  { %212 = vrcp.f32 %v169_v10  ;;  %v181_v14 = vand.u32 2147483648, %v169_v10  ;;  %v179_v16 = vand.u32 2147483647, %v169_v10  ;;  %vm175_vm9 = vweird.f32 %v169_v10 }
 0x27b   :  { %v182_v18 = vor.u32 1.1754944e-38, %v181_v14  ;;  %vm180_vm11 = vcmp.eq.f32.partialorder %v179_v16, 8.507059e+37 }
 0x27f   :  { %v213_v11 = vpop.eup %212 }
 0x280   :  { %v171_v12 = vmul.f32 %v213_v11, %v169_v10  ;;  %vm176_vm8 = vweird.f32 %v213_v11 }
 0x281   :  { %vm177_vm10 = vmor %vm175_vm9, %vm176_vm8 }
 0x282   :  { %v172_v13 = vsub.f32 1.0, %v171_v12 }
 0x284   :  { %v173_v15 = vmul.f32 %v213_v11, %v172_v13 }
 0x286   :  { %v174_v17 = vadd.f32 %v213_v11, %v173_v15 }
 0x288   :  { %v178_v19 = vsel %vm177_vm10, %v213_v11, %v174_v17 }
 0x289   :  { %v183_v20 = vsel %vm180_vm11, %v182_v18, %v178_v19 }
 0x28a   :  { %v184_v21 = vmul.f32 %v211_v8, %v183_v20 }
 0x28c   :  { %185 = vst.msk [vmem:[#allocation2] sm:$0x3] %vm160_vm7, %v184_v21 }
 0x28d   :  { %196 = dma.vmem_to_hbm [thread:$0]  %s192_s11, 32, %s194_s14, [#allocation3]  }
 0x28e   :  { %238 = dma.done.wait [#allocation3], 32  }
 0x28f   :  { %239 = vsyncadd [#allocation3], 4294967264 }
 0x290   :  { %201 = vsyncpa [#allocation3], 1 }

</bundles_post_ra>
